<compile_context>
chip_gen: v7x
topology: tpu7x:2x2x1
jax: 0.10.0
libtpu: 0.0.40
codegen_flags: <defaults>
</compile_context>

<pallas_src>
import jax
import jax.numpy as jnp
from jax.experimental import pallas as pl
from jax.experimental.pallas import tpu as pltpu

DIM_INPUT = 12
HID_FC1 = 32
HID_RNN = 16
OUT_DIM = 2
GATE_PAD = 128          # lane-dense width for the fused gate slab / FC2 output


def _rnn_kernel(nvalid_ref,            # SMEM (1,) int32 : max(lengths)
                x_ref,                 # (T*Bp, D)  f32  : time-major input slab
                len_ref,               # (Bp, 1)    i32  : per-row lengths
                w1b1_ref,              # (D+1, 32)  f32  : rows 0..D-1 = W1, row D = b1
                wih_ref,               # (33, 128)  f32  : rows 0..31 = [Wir|Wiz|Win|0], row 32 = fused bi
                whh_ref,               # (17, 128)  f32  : rows 0..15 = [Whr|Whz|Whn|0], row 16 = bhn row
                w2b2_ref,              # (17, 128)  f32  : rows 0..15 = W2 (padded), row 16 = b2
                out_ref,               # (Bp, 128)  f32  : lane-dense output
                gi_scr):               # (T*Bp, 128) f32 : fused gate projections for all t
    Bp = out_ref.shape[0]
    H = HID_RNN

    # ---- phase 1: all h-independent math as two big, lane-dense GEMMs -------
    w1b1 = w1b1_ref[...]
    w1 = w1b1[:DIM_INPUT, :]                        # (D, 32)
    b1 = w1b1[DIM_INPUT:DIM_INPUT + 1, :]           # (1, 32)
    x = jnp.maximum(x_ref[...], 0.0)                # relu      (dropout1 = identity)
    a = jnp.tanh(jnp.dot(x, w1, preferred_element_type=jnp.float32) + b1)   # (T*Bp, 32)

    wih_bi = wih_ref[...]
    wih = wih_bi[:HID_FC1, :]                       # (32, 128) fused [Wir|Wiz|Win|0]
    bi = wih_bi[HID_FC1:HID_FC1 + 1, :]             # (1, 128)  [bir+bhr | biz+bhz | bin | 0]
    # one fused matmul for all three gates; full-128-lane unmasked scratch store
    gi_scr[...] = jnp.dot(a, wih, preferred_element_type=jnp.float32) + bi

    # ---- phase 2: serial recurrence; h / sel live in vregs (loop carries) ---
    whh_bhn = whh_ref[...]
    whh = whh_bhn[:H, :]                            # (16, 128) fused [Whr|Whz|Whn|0]
    # bhn occupies lanes 32:48 of this row (zeros elsewhere) -> adding it to the
    # gh slab only biases the n-gate, keeping bhn inside r*(gh_n + bhn).
    bhn_b = jnp.broadcast_to(whh_bhn[H:H + 1, :], (Bp, GATE_PAD))   # hoisted broadcast
    len_m1 = len_ref[...] - 1                       # (Bp, 1)
    n_valid = nvalid_ref[0]

    def step(t, carry):
        h_prev, sel = carry
        row = pl.multiple_of(t * Bp, Bp)            # sublane-aligned slice start
        gi = gi_scr[pl.ds(row, Bp), :]              # (Bp, 128) precomputed gates
        gh = jnp.dot(h_prev, whh, preferred_element_type=jnp.float32) + bhn_b
        rz = jax.nn.sigmoid(gi[:, :2 * H] + gh[:, :2 * H])
        r, z = rz[:, :H], rz[:, H:]
        n = jnp.tanh(gi[:, 2 * H:3 * H] + r * gh[:, 2 * H:3 * H])
        h_new = (1.0 - z) * n + z * h_prev
        sel = jnp.where(len_m1 == t, h_new, sel)    # hidden at t = lengths-1
        return h_new, sel

    h0 = jnp.zeros((Bp, H), jnp.float32)
    _, sel = jax.lax.fori_loop(0, n_valid, step, (h0, h0))

    # ---- FC2 head on the selected hidden states, lane-dense output ----------
    w2b2 = w2b2_ref[...]
    res = jnp.maximum(sel, 0.0)                     # relu (dropout3/4 = identity)
    out_ref[...] = (jnp.dot(res, w2b2[:H, :], preferred_element_type=jnp.float32)
                    + w2b2[H:H + 1, :])


def my_variable_rnn_forward(seqs, lengths, params):
    """seqs: (B, T, D) float32, lengths: (B,) int (all >= 1) -> (B, 2) float32."""
    B, T, D = seqs.shape
    H = HID_RNN
    Bp = ((B + 7) // 8) * 8                          # pad batch to full sublanes

    seqs_p = jnp.zeros((Bp, T, D), jnp.float32).at[:B].set(seqs.astype(jnp.float32))
    len_p = jnp.ones((Bp,), jnp.int32).at[:B].set(lengths.astype(jnp.int32))

    # time-major slab for the phase-1 GEMMs: row t*Bp + b holds seqs[b, t, :]
    x_flat = jnp.transpose(seqs_p, (1, 0, 2)).reshape(T * Bp, D)
    len_col = len_p.reshape(Bp, 1)
    n_valid = jnp.max(len_p).astype(jnp.int32).reshape(1)

    # fused per-gate GRU weights (PyTorch order r | z | n), biases pre-folded,
    # everything pre-concatenated into a handful of lane-dense arrays.
    Wih, Whh = params["Wih"].astype(jnp.float32), params["Whh"].astype(jnp.float32)
    bih = params["bih"].reshape(-1).astype(jnp.float32)
    bhh = params["bhh"].reshape(-1).astype(jnp.float32)
    bi = jnp.concatenate([bih[:H] + bhh[:H],          # r: both biases foldable
                          bih[H:2 * H] + bhh[H:2 * H],  # z: both biases foldable
                          bih[2 * H:]])                 # n: only bih foldable
    bhn = bhh[2 * H:]                                   # stays inside r*(gh_n + bhn)

    w1b1 = jnp.concatenate([params["W1"].astype(jnp.float32),
                            params["b1"].astype(jnp.float32)], axis=0)      # (D+1, 32)
    wih_bi = (jnp.zeros((HID_FC1 + 1, GATE_PAD), jnp.float32)
              .at[:HID_FC1, :3 * H].set(Wih)
              .at[HID_FC1, :3 * H].set(bi))                                 # (33, 128)
    whh_bhn = (jnp.zeros((H + 1, GATE_PAD), jnp.float32)
               .at[:H, :3 * H].set(Whh)
               .at[H, 2 * H:3 * H].set(bhn))                                # (17, 128)
    w2b2 = (jnp.zeros((H + 1, GATE_PAD), jnp.float32)
            .at[:H, :OUT_DIM].set(params["W2"].astype(jnp.float32))
            .at[H, :OUT_DIM].set(params["b2"].reshape(-1).astype(jnp.float32)))  # (17, 128)

    vmem = lambda: pl.BlockSpec(memory_space=pltpu.MemorySpace.VMEM)
    smem = lambda: pl.BlockSpec(memory_space=pltpu.MemorySpace.SMEM)

    out = pl.pallas_call(
        _rnn_kernel,
        out_shape=jax.ShapeDtypeStruct((Bp, GATE_PAD), jnp.float32),
        in_specs=[smem()] + [vmem() for _ in range(6)],
        out_specs=vmem(),
        scratch_shapes=[
            pltpu.VMEM((T * Bp, GATE_PAD), jnp.float32),   # fused gi for all timesteps
        ],
    )(n_valid, x_flat, len_col, w1b1, wih_bi, whh_bhn, w2b2)
    return out[:B, :OUT_DIM]


def reference_forward(seqs, lengths, params):
    """Pure-JAX reference mirroring the PyTorch module (eval mode)."""
    x = jnp.maximum(seqs, 0.0)
    a = jnp.tanh(x @ params["W1"] + params["b1"])        # (B, T, 32)
    B, T, _ = a.shape
    H = HID_RNN

    def step(h, xt):
        gi = xt @ params["Wih"] + params["bih"][0]
        gh = h @ params["Whh"] + params["bhh"][0]
        r = jax.nn.sigmoid(gi[:, :H] + gh[:, :H])
        z = jax.nn.sigmoid(gi[:, H:2 * H] + gh[:, H:2 * H])
        n = jnp.tanh(gi[:, 2 * H:] + r * gh[:, 2 * H:])
        h_new = (1.0 - z) * n + z * h
        return h_new, h_new

    h0 = jnp.zeros((B, H), jnp.float32)
    _, hs = jax.lax.scan(step, h0, jnp.transpose(a, (1, 0, 2)))
    hs = jnp.transpose(hs, (1, 0, 2))                    # (B, T, 16)
    sel = hs[jnp.arange(B), lengths - 1, :]
    res = jnp.maximum(sel, 0.0)
    return res @ params["W2"] + params["b2"]


def init_params(key):
    ks = jax.random.split(key, 8)
    u = lambda k, shape, scale: jax.random.uniform(
        k, shape, jnp.float32, -scale, scale)
    return {
        "W1":  u(ks[0], (DIM_INPUT, HID_FC1), 1.0 / DIM_INPUT ** 0.5),
        "b1":  u(ks[1], (1, HID_FC1), 1.0 / DIM_INPUT ** 0.5),
        "Wih": u(ks[2], (HID_FC1, 3 * HID_RNN), 1.0 / HID_RNN ** 0.5),
        "Whh": u(ks[3], (HID_RNN, 3 * HID_RNN), 1.0 / HID_RNN ** 0.5),
        "bih": u(ks[4], (1, 3 * HID_RNN), 1.0 / HID_RNN ** 0.5),
        "bhh": u(ks[5], (1, 3 * HID_RNN), 1.0 / HID_RNN ** 0.5),
        "W2":  u(ks[6], (HID_RNN, OUT_DIM), 1.0 / HID_RNN ** 0.5),
        "b2":  u(ks[7], (1, OUT_DIM), 1.0 / HID_RNN ** 0.5),
    }


if __name__ == "__main__":
    key = jax.random.PRNGKey(0)
    k_param, k_data = jax.random.split(key)

    B, T, D = 4, 6, DIM_INPUT
    params = init_params(k_param)
    seqs = jax.random.normal(k_data, (B, T, D), jnp.float32)
    lengths = jnp.array([6, 5, 3, 1], dtype=jnp.int32)   # sorted desc, all >= 1

    out = my_variable_rnn_forward(seqs, lengths, params)
    out = jax.block_until_ready(out)

    ref = reference_forward(seqs, lengths, params)
    assert out.shape == (B, OUT_DIM)
    assert jnp.allclose(out, ref, atol=1e-5, rtol=1e-5), (out, ref)
    print("KERNEL_OK")
</pallas_src>

<mosaic_0001>
module attributes {stable_mosaic.version = 11 : i64} {
  func.func @_rnn_kernel(%arg0: memref<1xi32, #tpu.memory_space<smem>>, %arg1: memref<48x12xf32, #tpu.memory_space<vmem>>, %arg2: memref<8x1xi32, #tpu.memory_space<vmem>>, %arg3: memref<13x32xf32, #tpu.memory_space<vmem>>, %arg4: memref<33x128xf32, #tpu.memory_space<vmem>>, %arg5: memref<17x128xf32, #tpu.memory_space<vmem>>, %arg6: memref<17x128xf32, #tpu.memory_space<vmem>>, %arg7: memref<8x128xf32, #tpu.memory_space<vmem>>, %arg8: memref<48x128xf32, #tpu.memory_space<vmem>>) attributes {dimension_semantics = [], scalar_prefetch = 0 : i64, scratch_operands = 1 : i64, tpu.core_type = #tpu.core_type<tc>} {
    %c0 = arith.constant 0 : index
    %c0_0 = arith.constant 0 : index
    %0 = vector.load %arg3[%c0, %c0_0] : memref<13x32xf32, #tpu.memory_space<vmem>>, vector<13x32xf32>
    %1 = vector.extract_strided_slice %0 {offsets = [0, 0], sizes = [12, 32], strides = [1, 1]} : vector<13x32xf32> to vector<12x32xf32>
    %2 = vector.extract_strided_slice %0 {offsets = [12, 0], sizes = [1, 32], strides = [1, 1]} : vector<13x32xf32> to vector<1x32xf32>
    %c0_1 = arith.constant 0 : index
    %c0_2 = arith.constant 0 : index
    %3 = vector.load %arg1[%c0_1, %c0_2] : memref<48x12xf32, #tpu.memory_space<vmem>>, vector<48x12xf32>
    %cst = arith.constant 0.000000e+00 : f32
    %4 = vector.broadcast %cst : f32 to vector<48x12xf32>
    %5 = arith.maximumf %3, %4 : vector<48x12xf32>
    %cst_3 = arith.constant dense<0.000000e+00> : vector<48x32xf32>
    %6 = tpu.matmul %5, %1, %cst_3 {dimension_numbers = #tpu.dot_dimension_numbers<[1], [0], [0], [1], [0, 0, 1, 1], [], []>} : vector<48x12xf32>, vector<12x32xf32>, vector<48x32xf32> -> vector<48x32xf32>
    %7 = vector.broadcast %2 : vector<1x32xf32> to vector<48x32xf32>
    %8 = arith.addf %6, %7 : vector<48x32xf32>
    %9 = math.tanh %8 : vector<48x32xf32>
    %c0_4 = arith.constant 0 : index
    %c0_5 = arith.constant 0 : index
    %10 = vector.load %arg4[%c0_4, %c0_5] : memref<33x128xf32, #tpu.memory_space<vmem>>, vector<33x128xf32>
    %11 = vector.extract_strided_slice %10 {offsets = [0, 0], sizes = [32, 128], strides = [1, 1]} : vector<33x128xf32> to vector<32x128xf32>
    %12 = vector.extract_strided_slice %10 {offsets = [32, 0], sizes = [1, 128], strides = [1, 1]} : vector<33x128xf32> to vector<1x128xf32>
    %cst_6 = arith.constant dense<0.000000e+00> : vector<48x128xf32>
    %13 = tpu.matmul %9, %11, %cst_6 {dimension_numbers = #tpu.dot_dimension_numbers<[1], [0], [0], [1], [0, 0, 1, 1], [], []>} : vector<48x32xf32>, vector<32x128xf32>, vector<48x128xf32> -> vector<48x128xf32>
    %14 = vector.broadcast %12 : vector<1x128xf32> to vector<48x128xf32>
    %15 = arith.addf %13, %14 : vector<48x128xf32>
    %c0_7 = arith.constant 0 : index
    %c0_8 = arith.constant 0 : index
    %16 = vector.load %arg8[%c0_7, %c0_8] : memref<48x128xf32, #tpu.memory_space<vmem>>, vector<48x128xf32>
    tpu.vector_store %arg8[%c0_7, %c0_8], %15 {strides = array<i32>} : memref<48x128xf32, #tpu.memory_space<vmem>>, vector<48x128xf32>,
    %c0_9 = arith.constant 0 : index
    %c0_10 = arith.constant 0 : index
    %17 = vector.load %arg5[%c0_9, %c0_10] : memref<17x128xf32, #tpu.memory_space<vmem>>, vector<17x128xf32>
    %18 = vector.extract_strided_slice %17 {offsets = [0, 0], sizes = [16, 128], strides = [1, 1]} : vector<17x128xf32> to vector<16x128xf32>
    %19 = vector.extract_strided_slice %17 {offsets = [16, 0], sizes = [1, 128], strides = [1, 1]} : vector<17x128xf32> to vector<1x128xf32>
    %20 = vector.shape_cast %19 : vector<1x128xf32> to vector<1x128xf32>
    %21 = vector.broadcast %20 : vector<1x128xf32> to vector<8x128xf32>
    %c0_11 = arith.constant 0 : index
    %c0_12 = arith.constant 0 : index
    %22 = vector.load %arg2[%c0_11, %c0_12] : memref<8x1xi32, #tpu.memory_space<vmem>>, vector<8x1xi32>
    %c1_i32 = arith.constant 1 : i32
    %23 = vector.broadcast %c1_i32 : i32 to vector<8x1xi32>
    %24 = arith.subi %22, %23 : vector<8x1xi32>
    %c0_13 = arith.constant 0 : index
    %25 = memref.load %arg0[%c0_13] : memref<1xi32, #tpu.memory_space<smem>>
    %cst_14 = arith.constant 0.000000e+00 : f32
    %26 = vector.broadcast %cst_14 : f32 to vector<8x16xf32>
    %c0_i32 = arith.constant 0 : i32
    %27 = arith.subi %25, %c0_i32 : i32
    %28 = arith.addi %c0_i32, %27 : i32
    %c1_i32_15 = arith.constant 1 : i32
    %29:2 = scf.for %arg9 = %c0_i32 to %28 step %c1_i32_15 iter_args(%arg10 = %26, %arg11 = %26) -> (vector<8x16xf32>, vector<8x16xf32>)  : i32 {
      %c8_i32 = arith.constant 8 : i32
      %39 = arith.muli %arg9, %c8_i32 : i32
      %40 = tpu.assume_multiple %39, 8 : i32
      %41 = arith.index_cast %40 : i32 to index
      %c0_22 = arith.constant 0 : index
      %42 = vector.load %arg8[%41, %c0_22] : memref<48x128xf32, #tpu.memory_space<vmem>>, vector<8x128xf32>
      %cst_23 = arith.constant dense<0.000000e+00> : vector<8x128xf32>
      %43 = tpu.matmul %arg10, %18, %cst_23 {dimension_numbers = #tpu.dot_dimension_numbers<[1], [0], [0], [1], [0, 0, 1, 1], [], []>} : vector<8x16xf32>, vector<16x128xf32>, vector<8x128xf32> -> vector<8x128xf32>
      %44 = arith.addf %43, %21 : vector<8x128xf32>
      %45 = vector.extract_strided_slice %42 {offsets = [0, 0], sizes = [8, 32], strides = [1, 1]} : vector<8x128xf32> to vector<8x32xf32>
      %46 = vector.extract_strided_slice %44 {offsets = [0, 0], sizes = [8, 32], strides = [1, 1]} : vector<8x128xf32> to vector<8x32xf32>
      %47 = arith.addf %45, %46 : vector<8x32xf32>
      %48 = arith.negf %47 : vector<8x32xf32>
      %49 = math.exp %48 : vector<8x32xf32>
      %cst_24 = arith.constant 1.000000e+00 : f32
      %50 = vector.broadcast %cst_24 : f32 to vector<8x32xf32>
      %51 = arith.addf %50, %49 : vector<8x32xf32>
      %52 = arith.divf %50, %51 : vector<8x32xf32>
      %53 = vector.extract_strided_slice %52 {offsets = [0, 0], sizes = [8, 16], strides = [1, 1]} : vector<8x32xf32> to vector<8x16xf32>
      %54 = vector.extract_strided_slice %52 {offsets = [0, 16], sizes = [8, 16], strides = [1, 1]} : vector<8x32xf32> to vector<8x16xf32>
      %55 = vector.extract_strided_slice %42 {offsets = [0, 32], sizes = [8, 16], strides = [1, 1]} : vector<8x128xf32> to vector<8x16xf32>
      %56 = vector.extract_strided_slice %44 {offsets = [0, 32], sizes = [8, 16], strides = [1, 1]} : vector<8x128xf32> to vector<8x16xf32>
      %57 = arith.mulf %53, %56 : vector<8x16xf32>
      %58 = arith.addf %55, %57 : vector<8x16xf32>
      %59 = math.tanh %58 : vector<8x16xf32>
      %cst_25 = arith.constant 1.000000e+00 : f32
      %60 = vector.broadcast %cst_25 : f32 to vector<8x16xf32>
      %61 = arith.subf %60, %54 : vector<8x16xf32>
      %62 = arith.mulf %61, %59 : vector<8x16xf32>
      %63 = arith.mulf %54, %arg10 : vector<8x16xf32>
      %64 = arith.addf %62, %63 : vector<8x16xf32>
      %65 = vector.broadcast %arg9 : i32 to vector<8x1xi32>
      %66 = arith.cmpi eq, %24, %65 : vector<8x1xi32>
      %67 = vector.shape_cast %66 : vector<8x1xi1> to vector<8x1xi1>
      %68 = vector.broadcast %67 : vector<8x1xi1> to vector<8x16xi1>
      %69 = arith.select %68, %64, %arg11 : vector<8x16xi1>, vector<8x16xf32>
      scf.yield %64, %69 : vector<8x16xf32>, vector<8x16xf32>
    }
    %c0_16 = arith.constant 0 : index
    %c0_17 = arith.constant 0 : index
    %30 = vector.load %arg6[%c0_16, %c0_17] : memref<17x128xf32, #tpu.memory_space<vmem>>, vector<17x128xf32>
    %cst_18 = arith.constant 0.000000e+00 : f32
    %31 = vector.broadcast %cst_18 : f32 to vector<8x16xf32>
    %32 = arith.maximumf %29#1, %31 : vector<8x16xf32>
    %33 = vector.extract_strided_slice %30 {offsets = [0, 0], sizes = [16, 128], strides = [1, 1]} : vector<17x128xf32> to vector<16x128xf32>
    %cst_19 = arith.constant dense<0.000000e+00> : vector<8x128xf32>
    %34 = tpu.matmul %32, %33, %cst_19 {dimension_numbers = #tpu.dot_dimension_numbers<[1], [0], [0], [1], [0, 0, 1, 1], [], []>} : vector<8x16xf32>, vector<16x128xf32>, vector<8x128xf32> -> vector<8x128xf32>
    %35 = vector.extract_strided_slice %30 {offsets = [16, 0], sizes = [1, 128], strides = [1, 1]} : vector<17x128xf32> to vector<1x128xf32>
    %36 = vector.broadcast %35 : vector<1x128xf32> to vector<8x128xf32>
    %37 = arith.addf %34, %36 : vector<8x128xf32>
    %c0_20 = arith.constant 0 : index
    %c0_21 = arith.constant 0 : index
    %38 = vector.load %arg7[%c0_20, %c0_21] : memref<8x128xf32, #tpu.memory_space<vmem>>, vector<8x128xf32>
    tpu.vector_store %arg7[%c0_20, %c0_21], %37 {strides = array<i32>} : memref<8x128xf32, #tpu.memory_space<vmem>>, vector<8x128xf32>,
    return
  }
}

</mosaic_0001>

<bundles_post_ra>
// kernel: tpu_custom_call.1
= control target key start
LH: loop header
LB: loop body
LE: loop exit
PB: predicated region body
PF: predicated region fallthrough
CT: control target
= control target key end

     0   :  { %13 = vsyncpa [#allocation5], 0  ;;  %s1008_s0 = inlined_call_operand.<no memory space> [shape: s32[1], index: 0, kind: input, shape index: {}]   ;;  %s1009_s1 = inlined_call_operand.vmem [shape: f32[48,12], index: 1, kind: input, shape index: {}]   ;;  %s1010_s2 = inlined_call_operand.vmem [shape: s32[8,1], index: 2, kind: input, shape index: {}]   ;;  %s1011_s3 = inlined_call_operand.hbm [shape: f32[13,32], index: 3, kind: input, shape index: {}]   ;;  %s1012_s4 = inlined_call_operand.vmem [shape: f32[33,128], index: 4, kind: input, shape index: {}]   ;;  %s1013_s5 = inlined_call_operand.vmem [shape: f32[17,128], index: 5, kind: input, shape index: {}]   ;;  %s1014_s6 = inlined_call_operand.vmem [shape: f32[17,128], index: 6, kind: input, shape index: {}]   ;;  %s1015_s7 = inlined_call_operand.hbm [shape: f32[8,128], index: 7, kind: output, shape index: {}]  }
   0x1   :  { %14 = vsyncpa [#allocation6], 0  ;;  %s815_s24 = smov [#allocation4]   ;;  %s735_s28 = scalar_lea.hbm %s1011_s3, 256 }
   0x2   :  { %s26_s25 = sshll.u32 %s815_s24, 4  ;;  %p736_p0 = scmp.ne.s32.totalorder %s1011_s3, %s735_s28  ;;  %s27_s25 = int_to_ptr.vmem [resolvable:$true] %s26_s25 }
   0x3   :  { %p739_p1 = scmp.lt.u32.totalorder %s735_s28, %s1011_s3 }
   0x5   :  { %p741_p2 = pnand %p739_p1, %p736_p0 }
   0x7   :  { %744 = shalt.err (!%p741_p2)
}
   0x8   :  { %s745_s10 = scalar_lea.vmem %s27_s25, 256  ;;  %p750_p4 = scmp.lt.s32.totalorder %s27_s25, %s27_s25 }
   0x9   :  { %p746_p3 = scmp.ne.s32.totalorder %s27_s25, %s745_s10  ;;  %p751_p5 = scmp.lt.s32.totalorder %s745_s10, %s745_s10 }
   0xb   :  { %p752_p6 = por %p751_p5, %p750_p4 }
   0xd   :  { %p753_p7 = pnand %p752_p6, %p746_p3 }
   0xf   :  { %756 = shalt.err (!%p753_p7)
}
  0x10   :  { %s816_s11 = smov 128   ;;  %s817_s12 = smov 8  }
  0x11   :  { %32 = dma.hbm_to_vmem [thread:$0]  %s1011_s3, 256, %s27_s25, [#allocation5], %s816_s11, %s816_s11, %s817_s12  }
  0x12   :  { %795 = dma.done.wait [#allocation5], 256  }
  0x13   :  { %796 = vsyncadd [#allocation5], 4294967040  ;;  %vm79_vm0 = vcmask 1043456   ;;  %vm818_vm1 = vmmov 1   ;;  %v890_v1 = vld [vmem:[%s1013_s5] sm:$0xff]  ;;  %v895_v2 = vld [vmem:[%s1013_s5 + $0x8] sm:$0xff]  ;;  %v56_v27 = vlaneseq }
  0x14   :  { %vm883_vm2 = vmpackc.low %vm79_vm0, %vm818_vm1  ;;  %v900_v3 = vld [vmem:[%s1013_s5 + $0x10] ss:$0 sm:$0xff]  ;;  %v320_v4 = vld [vmem:[%s1010_s2] sm:$0xff]  ;;  %vm60_vm3 = vcmask 97280   ;;  %vm193_vm4 = vcmask 261120   ;;  %p573_p8 = scmp.le.s32.totalorder %s1008_s0, 0 }
  0x15   :  { %v42_v5 = vld [vmem:[#allocation4] sm:$0xff]  ;;  %v43_v6 = vld [vmem:[#allocation4 + $0x8] sm:$0x1f]  ;;  %v905_v7 = vadd.s32 4294967295, %v320_v4  ;;  %v44_v9 = vld [vmem:[%s1009_s1] sm:$0xff]  ;;  %v57_v28 = vshrl.u32 %v56_v27, 7 }
  0x16   :  { %v647_v8 = vpack.c.bf16 %v43_v6, %v42_v5  ;;  %v45_v10 = vld [vmem:[%s1009_s1 + $0x8] sm:$0xff]  ;;  %v46_v11 = vld [vmem:[%s1009_s1 + $0x10] sm:$0xff]  ;;  %v50_v12 = vmax.f32 %v44_v9, 0.0  ;;  %v47_v15 = vld [vmem:[%s1009_s1 + $0x18] sm:$0xff]  ;;  %v953_v62 = vmov 0.0   ;;  %v955_v63 = vmov (!%p573_p8), 0.0  }
  0x17   :  { %v51_v13 = vmax.f32 %v45_v10, 0.0  ;;  %v52_v14 = vmax.f32 %v46_v11, 0.0  ;;  %v48_v16 = vld [vmem:[%s1009_s1 + $0x20] sm:$0xff]  ;;  %v53_v17 = vmax.f32 %v47_v15, 0.0  ;;  %v49_v19 = vld [vmem:[%s1009_s1 + $0x28] sm:$0xff]  ;;  %v186_v24 = vld [vmem:[%s1012_s4 + $0x10] sm:$0xff] }
  0x18   :  { %649 = vmatprep.subr.msk.bf16.mxu0 %vm883_vm2, %v647_v8  ;;  %607 = vmatprep.mubr.msk.f32.mxu0 %vm60_vm3, %v50_v12  ;;  %v54_v18 = vmax.f32 %v48_v16, 0.0  ;;  %v55_v20 = vmax.f32 %v49_v19, 0.0  ;;  %v184_v21 = vld [vmem:[%s1012_s4] sm:$0xff]  ;;  %v185_v22 = vld [vmem:[%s1012_s4 + $0x8] sm:$0xff]  ;;  %v187_v25 = vld [vmem:[%s1012_s4 + $0x18] sm:$0xff]  ;;  %v58_v29 = vsub.s32 4, %v57_v28 }
  0x19   :  { %652 = vmatpush3.bf16.msk.msra.mxu0 %vm883_vm2, %v647_v8  ;;  %v653_v23 = vpack.c.bf16 %v185_v22, %v184_v21  ;;  %v657_v26 = vpack.c.bf16 %v187_v25, %v186_v24  ;;  %v564_v49 = vld [vmem:[%s1012_s4 + $0x20] ss:$0 sm:$0xff]  ;;  %v957_v0 = vmov (!%p573_p8), 0.0   ;;  %s959_s19 = smov (!%p573_p8), 0  }
  0x1a   :  { %v59_v30 = vrot.slane %v43_v6, %v58_v29 }
  0x1b   :  { %654 = vmatprep.subr.bf16.mxu1 %v653_v23 }
  0x1c   :  { %608 = vmatmul.mubr.msk.f32.vlgmr.msra.gmra.mrb[0].mxu0 %vm60_vm3, %v51_v13  ;;  %656 = vmatpush3.bf16.msra.mxu1 %v653_v23 }
  0x1d   :  { %610 = vmatprep.mubr.msk.f32.mxu0 %vm60_vm3, %v52_v14  ;;  %658 = vmatprep.subr.bf16.mxu1 %v657_v26 }
  0x20   :  { %611 = vmatmul.mubr.msk.f32.gmra.mrb[2].mxu0 %vm60_vm3, %v53_v17  ;;  %660 = vmatpush3.bf16.msra.mxu1 %v657_v26 }
  0x21   :  { %613 = vmatprep.mubr.msk.f32.mxu0 %vm60_vm3, %v54_v18 }
  0x24   :  { %614 = vmatmul.mubr.msk.f32.gmra.mrb[4].mxu0 %vm60_vm3, %v55_v20 }
  0xef   :  { %v609_v31 = vpop.f32.mrb[0].mxu0 }
  0xf0   :  { %v155_v32 = vadd.f32 %v609_v31, %v59_v30  ;;  %v149_v33 = vpop.f32.mrb[1].mxu0 }
  0xf1   :  { %v150_v34 = vadd.f32 %v149_v33, %v59_v30 }
  0xf3   :  { %715 = vtanh.f32 %v150_v34  ;;  %v612_v35 = vpop.f32.mrb[2].mxu0 }
  0xf4   :  { %717 = vtanh.f32 %v155_v32  ;;  %v165_v36 = vadd.f32 %v612_v35, %v59_v30  ;;  %v159_v37 = vpop.f32.mrb[3].mxu0 }
  0xf5   :  { %v160_v38 = vadd.f32 %v159_v37, %v59_v30 }
  0xf7   :  { %719 = vtanh.f32 %v160_v38  ;;  %v615_v39 = vpop.f32.mrb[4].mxu0 }
  0xf8   :  { %721 = vtanh.f32 %v165_v36  ;;  %v175_v40 = vadd.f32 %v615_v39, %v59_v30  ;;  %v169_v41 = vpop.f32.mrb[5].mxu0 }
  0xf9   :  { %v170_v42 = vadd.f32 %v169_v41, %v59_v30 }
  0xfb   :  { %723 = vtanh.f32 %v170_v42 }
  0xfc   :  { %725 = vtanh.f32 %v175_v40 }
  0xfd   :  { %v716_v43 = vpop.eup %715 }
  0xfe   :  { %v718_v44 = vpop.eup %717  ;;  %624 = vmatprep.mubr.msk.f32.mxu1 %vm193_vm4, %v716_v43 }
  0xff   :  { %625 = vmatmul.mubr.msk.f32.vlgmr.msra.gmra.mrb[0].mxu1 %vm193_vm4, %v718_v44 }
 0x101   :  { %v720_v45 = vpop.eup %719 }
 0x102   :  { %v722_v46 = vpop.eup %721  ;;  %627 = vmatprep.mubr.msk.f32.mxu1 %vm193_vm4, %v720_v45 }
 0x103   :  { %628 = vmatmul.mubr.msk.f32.gmra.mrb[2].mxu1 %vm193_vm4, %v722_v46 }
 0x105   :  { %v724_v47 = vpop.eup %723 }
 0x106   :  { %v726_v48 = vpop.eup %725  ;;  %630 = vmatprep.mubr.msk.f32.mxu1 %vm193_vm4, %v724_v47 }
 0x107   :  { %631 = vmatmul.mubr.msk.f32.gmra.mrb[4].mxu1 %vm193_vm4, %v726_v48 }
 0x1d2   :  { %v626_v50 = vpop.f32.mrb[0].mxu1 }
 0x1d3   :  { %v284_v51 = vadd.f32 %v626_v50, %v564_v49  ;;  %v278_v52 = vpop.f32.mrb[1].mxu1 }
 0x1d4   :  { %v279_v53 = vadd.f32 %v564_v49, %v278_v52 }
 0x1d5   :  { %308 = vst [vmem:[#allocation2 + $0x8] sm:$0xff] %v284_v51 }
 0x1d6   :  { %307 = vst [vmem:[#allocation2] sm:$0xff] %v279_v53  ;;  %v629_v54 = vpop.f32.mrb[2].mxu1 }
 0x1d7   :  { %v294_v55 = vadd.f32 %v629_v54, %v564_v49  ;;  %v288_v56 = vpop.f32.mrb[3].mxu1 }
 0x1d8   :  { %v289_v57 = vadd.f32 %v564_v49, %v288_v56  ;;  %550 = sbr.rel (%p573_p8) target bundleno = 1175 (0x497), region = 54 }
 0x1d9   :  { %310 = vst [vmem:[#allocation2 + $0x18] sm:$0xff] %v294_v55 }
 0x1da   :  { %309 = vst [vmem:[#allocation2 + $0x10] sm:$0xff] %v289_v57  ;;  %v632_v58 = vpop.f32.mrb[4].mxu1 }
 0x1db   :  { %v304_v59 = vadd.f32 %v632_v58, %v564_v49  ;;  %v298_v60 = vpop.f32.mrb[5].mxu1 }
 0x1dc   :  { %v299_v61 = vadd.f32 %v564_v49, %v298_v60 }
 0x1dd   :  { %312 = vst [vmem:[#allocation2 + $0x28] sm:$0xff] %v304_v59 }
 0x1de   :  { %311 = vst [vmem:[#allocation2 + $0x20] sm:$0xff] %v299_v61 }
 0x1df LB: > { %v662_v4 = vpack.c.bf16 %v895_v2, %v890_v1  ;;  %v819_v5 = vmov 0.0|0.0   ;;  %s820_s3 = smov 112   ;;  %vm821_vm5 = vmmov 0   ;;  %v822_v6 = vmov 0.0   ;;  %s823_s20 = smov 96   ;;  %s809_s19 = sphi %s959_s19, %s326_s19   ;;  %v805_v0 = vphi %v957_v0, %v435_v0   ;;  %v801_v63 = vphi %v955_v63, %v1018_v63  }
 0x1e0   : > { %661 = vmatprep.subr.bf16.mxu0 %v819_v5  ;;  %335 = vrot.lane.b32.xlu0 %v805_v0, %s820_s3  ;;  %vm337_vm6 = vcmask 130048   ;;  %s574_s21 = sshll.u32 %s809_s19, 3  ;;  %v824_v17 = vmov 0   ;;  %v436_v18 = vstv %s809_s19  ;;  %s825_s23 = smov 32  }
 0x1e1   : > { %663 = vmatpush3.bf16.msra.mxu0 %v662_v4  ;;  %637 = vmatprep.mubr.msk.f32.mxu0 %vm821_vm5, %v822_v6  ;;  %s332_s22 = scalar_lea.vmem [#allocation2], %s574_s21  ;;  %vm437_vm7 = vcmp.eq.s32.totalorder %v905_v7, %v436_v18  ;;  %s326_s19 = sadd.s32 1, %s809_s19  }
 0x1e2   : > { %727 = vset.pattern.permute.xlu1 %v824_v17  ;;  %728 = vset.pattern.permute.xlu0 %v824_v17  ;;  %v438_v22 = vsel %vm437_vm7, 1, %v824_v17  ;;  %p325_p9 = scmp.ge.s32.totalorder %s326_s19, %s1008_s0 }
 0x1e5   : > { %v333_v12 = vld [vmem:[%s332_s22] sm:$0xff] }
 0x252   : > { %v336_v8 = vpop.permute.xlu0 %335 }
 0x253   : > { %638 = vmatmul.mubr.msk.f32.vlgmr.msra.gmra.mrb[0].mxu0 %vm337_vm6, %v336_v8 }
 0x326   : > { %v406_v9 = vpop.f32.mrb[0].mxu0 }
 0x327   : > { %v407_v10 = vadd.f32 %v900_v3, %v406_v9  ;;  %v639_v11 = vpop.f32.mrb[1].mxu0 }
 0x329   : > { %418 = vrot.lane.b32.xlu0 %v407_v10, %s823_s20  ;;  %v410_v13 = vadd.f32 %v407_v10, %v333_v12 }
 0x32b   : > { %v576_v14 = vmul.f32 -1.442695, %v410_v13 }
 0x32d   : > { %729 = vpow2.f32 %v576_v14 }
 0x337   : > { %v730_v15 = vpop.eup %729 }
 0x338   : > { %v414_v16 = vadd.f32 1.0, %v730_v15 }
 0x33a   : > { %731 = vrcp.f32 %v414_v16 }
 0x344   : > { %v732_v19 = vpop.eup %731 }
 0x345   : > { %v428_v26 = vsub.f32 1.0, %v732_v19  ;;  %v434_v29 = vmul.f32 %v805_v0, %v732_v19 }
 0x39b   : > { %v419_v20 = vpop.permute.xlu0 %418 }
 0x39c   : > { %v421_v21 = vmul.f32 %v732_v19, %v419_v20 }
 0x39e   : > { %423 = vrot.lane.b32.xlu1 %v421_v21, %s825_s23 }
 0x3a2   : > { %440 = vperm.xlu1 %727, %v438_v22  }
 0x410   : > { %v424_v23 = vpop.permute.xlu1 %423 }
 0x411   : > { %v426_v24 = vadd.f32 %v424_v23, %v333_v12 }
 0x413   : > { %733 = vtanh.f32 %v426_v24 }
 0x41d   : > { %v734_v25 = vpop.eup %733 }
 0x41e   : > { %430 = vrot.lane.b32.xlu0 %v734_v25, %s820_s3 }
 0x421   : > { %v441_v27 = vpop.permute.xlu1 %440 }
 0x422   : > { %vm442_vm8 = vcmp.eq.s32.totalorder %v441_v27, 1 }
 0x490   : > { %v431_v28 = vpop.permute.xlu0 %430  ;;  %328 = sbr.rel (!%p325_p9) target bundleno = 479 (0x1df), region = 60 }
 0x491   : > { %v433_v30 = vmul.f32 %v431_v28, %v428_v26 }
 0x493   : > { %v435_v0 = vadd.f32 %v434_v29, %v433_v30  }
 0x495   : > { %v443_v31 = vsel %vm442_vm8, %v435_v0, %v801_v63  }
 0x496   : > { %v1018_v63 = vmov %v443_v31  ;;  %v1019_v62 = vmov (%p325_p9), %v443_v31 }
 0x497 PF:  { %v447_v32 = vmax.f32 %v813_v62, 0.0  ;;  %v444_v33 = vld [vmem:[%s1014_s6] sm:$0xff]  ;;  %v445_v34 = vld [vmem:[%s1014_s6 + $0x8] sm:$0xff]  ;;  %v826_v35 = vmov 0.0|0.0   ;;  %s827_s28 = smov 112   ;;  %vm828_vm9 = vmmov 0   ;;  %v813_v62 = vphi %v953_v62, %v1019_v62  }
 0x498   :  { %664 = vmatprep.subr.bf16.mxu0 %v826_v35  ;;  %v665_v36 = vpack.c.bf16 %v445_v34, %v444_v33  ;;  %v829_v1 = vmov 0.0   ;;  %vm455_vm10 = vcmask 130048   ;;  %v577_v3 = vld [vmem:[%s1014_s6 + $0x10] ss:$0 sm:$0xff]  ;;  %s830_s30 = smov [#allocation7]  }
 0x499   :  { %453 = vrot.lane.b32.xlu0 %v447_v32, %s827_s28  ;;  %644 = vmatprep.mubr.msk.f32.mxu0 %vm828_vm9, %v829_v1  ;;  %s535_s8 = sshll.u32 %s830_s30, 4  ;;  %s536_s8 = int_to_ptr.vmem [resolvable:$true] %s535_s8 }
 0x49a   :  { %666 = vmatpush3.bf16.msra.mxu0 %v665_v36  ;;  %s757_s9 = scalar_lea.vmem %s536_s8, 128  ;;  %p762_p11 = scmp.lt.s32.totalorder %s536_s8, %s536_s8 }
 0x49b   :  { %p758_p10 = scmp.ne.s32.totalorder %s536_s8, %s757_s9  ;;  %p763_p12 = scmp.lt.s32.totalorder %s757_s9, %s757_s9 }
 0x49d   :  { %p764_p13 = por %p763_p12, %p762_p11 }
 0x49f   :  { %p765_p0 = pnand %p764_p13, %p758_p10 }
 0x50b   :  { %v454_v2 = vpop.permute.xlu0 %453 }
 0x50c   :  { %645 = vmatmul.mubr.msk.f32.vlgmr.msra.gmra.mrb[0].mxu0 %vm455_vm10, %v454_v2 }
 0x5df   :  { %v524_v7 = vpop.f32.mrb[0].mxu0 }
 0x5e0   :  { %v525_v37 = vadd.f32 %v577_v3, %v524_v7  ;;  %v646_v38 = vpop.f32.mrb[1].mxu0 }
 0x5e2   :  { %528 = vst [vmem:[#allocation7] sm:$0xff] %v525_v37 }
 0x5e3   :  { %768 = shalt.err (!%p765_p0)
}
 0x5e4   :  { %s769_s12 = scalar_lea.hbm %s1015_s7, 128 }
 0x5e5   :  { %p770_p1 = scmp.ne.s32.totalorder %s1015_s7, %s769_s12  ;;  %p773_p2 = scmp.lt.u32.totalorder %s769_s12, %s1015_s7 }
 0x5e7   :  { %p775_p3 = pnand %p773_p2, %p770_p1 }
 0x5e9   :  { %778 = shalt.err (!%p775_p3)
}
 0x5ea   :  { %538 = dma.vmem_to_hbm [thread:$0]  %s536_s8, 128, %s1015_s7, [#allocation6]  }
 0x5eb   :  { %797 = dma.done.wait [#allocation6], 128  }
 0x5ec   :  { %798 = vsyncadd [#allocation6], 4294967168 }
 0x5ed   :  { %542 = vsyncpa [#allocation5], 1 }
 0x5ee   :  { %543 = vsyncpa [#allocation6], 1 }

</bundles_post_ra>
